<compile_context>
chip_gen: v7x
topology: tpu7x:2x2x1
jax: 0.10.0
libtpu: 0.0.40
codegen_flags: <defaults>
</compile_context>

<pallas_src>
import jax
import jax.numpy as jnp
from jax.experimental import pallas as pl
from jax.experimental.pallas import tpu as pltpu


def _round_up(x, m):
    return (x + m - 1) // m * m


def classifier_kernel(x_ref, w1_ref, w2_ref, w3_ref, o_ref):
    # x_ref : (TM, D)     f32   (cast to bf16 in-register; avoids an HBM copy)
    # w1_ref: (D, H1)     bf16
    # w2_ref: (H1, H2P)   bf16  (H2P = D//2 lane-padded to a multiple of 128)
    # w3_ref: (H2P, CP)   bf16  (CP  = num_classes lane-padded to 128)
    # o_ref : (TM, C)     f32   (unpadded logits)
    x_bf = x_ref[...].astype(jnp.bfloat16)
    h1 = jnp.dot(x_bf, w1_ref[...], preferred_element_type=jnp.float32)
    h1 = jnp.maximum(h1, 0.0).astype(jnp.bfloat16)            # ReLU
    h2 = jnp.dot(h1, w2_ref[...], preferred_element_type=jnp.float32)
    h2 = jnp.maximum(h2, 0.0).astype(jnp.bfloat16)            # ReLU
    res = jnp.dot(h2, w3_ref[...], preferred_element_type=jnp.float32)
    o_ref[...] = res[:, : o_ref.shape[-1]]                    # drop lane padding


def classifier_forward(x, w1, w2, w3, *, tm=512, core_parallel=False):
    """x: (B, num_fbanks, num_classes) f32. Weights are (in_features, out_features) f32.
    Returns (B, num_classes) f32 logits."""
    B = x.shape[0]
    D = 1
    for s in x.shape[1:]:
        D *= s
    H1 = w1.shape[1]
    H2 = w2.shape[1]
    C = w3.shape[1]

    # nn.Flatten(start_dim=1) -- layout glue, stays in plain JAX.
    x2d = x.reshape(B, D).astype(jnp.float32)

    # Adaptive batch tile: tiny batches are a single full-array block (no
    # padding); large batches are tiled at `tm` rows (multiple of 8) so the
    # grid loop amortizes the per-step overhead and fills the MXU.
    if B <= tm:
        tm_eff, Bp = B, B
        x_in = x2d
    else:
        tm_eff = tm
        Bp = _round_up(B, tm_eff)
        x_in = x2d if Bp == B else jnp.pad(x2d, ((0, Bp - B), (0, 0)))

    # Lane-pad the small weight trailing dims so all matmuls are lane-dense
    # (exact for bias-free linear + ReLU). Padded output columns are dropped
    # inside the kernel before the HBM store, so the output stays (Bp, C).
    H2P = _round_up(H2, 128)
    CP = _round_up(C, 128)
    w1_b = w1.astype(jnp.bfloat16)
    w2_p = jnp.zeros((H1, H2P), jnp.bfloat16).at[:, :H2].set(w2.astype(jnp.bfloat16))
    w3_p = jnp.zeros((H2P, CP), jnp.bfloat16).at[:H2, :C].set(w3.astype(jnp.bfloat16))

    # v7x: CORE_PARALLEL explicitly shards the batch grid axis across both TCs.
    dim_sem = (pltpu.CORE_PARALLEL,) if core_parallel else ("parallel",)

    flops = 2 * Bp * (D * H1 + H1 * H2P + H2P * CP)
    bytes_accessed = Bp * D * 4 + (D * H1 + H1 * H2P + H2P * CP) * 2 + Bp * C * 4

    out = pl.pallas_call(
        classifier_kernel,
        out_shape=jax.ShapeDtypeStruct((Bp, C), jnp.float32),
        grid=(Bp // tm_eff,),
        in_specs=[
            pl.BlockSpec((tm_eff, D), lambda i: (i, 0)),   # x: batch-tiled, pipelined
            # Weights: constant index_map -> DMA'd once, VMEM-resident across
            # all grid steps (~160 KB bf16 at D=128). If D ever grows toward
            # ~1.5-2K, add pipeline_mode=pl.Buffered(1) on these specs and a
            # vmem_limit_bytes override / K-tiling (v7x VMEM is only 64 MiB).
            pl.BlockSpec((D, H1), lambda i: (0, 0)),
            pl.BlockSpec((H1, H2P), lambda i: (0, 0)),
            pl.BlockSpec((H2P, CP), lambda i: (0, 0)),
        ],
        out_specs=pl.BlockSpec((tm_eff, C), lambda i: (i, 0)),
        compiler_params=pltpu.CompilerParams(dimension_semantics=dim_sem),
        cost_estimate=pl.CostEstimate(
            flops=flops, transcendentals=0, bytes_accessed=bytes_accessed),
    )(x_in, w1_b, w2_p, w3_p)

    return out[:B]


def init_params(key, num_fbanks, num_classes):
    """Deterministic init mirroring nn.Linear default (uniform +/- 1/sqrt(fan_in)).
    Weights returned pre-transposed as (in_features, out_features)."""
    D = num_fbanks * num_classes
    dims = [(D, 2 * D), (2 * D, D // 2), (D // 2, num_classes)]
    keys = jax.random.split(key, len(dims))
    ws = []
    for k, (fan_in, fan_out) in zip(keys, dims):
        bound = 1.0 / (fan_in ** 0.5)
        ws.append(jax.random.uniform(k, (fan_in, fan_out), jnp.float32,
                                     minval=-bound, maxval=bound))
    return ws


if __name__ == "__main__":
    # Small, module-consistent shapes.
    batch = 2
    num_fbanks = 16
    num_classes = 8  # D = 128, hidden1 = 256, hidden2 = 64

    key = jax.random.PRNGKey(0)
    kx, kp, kx2 = jax.random.split(key, 3)
    x = jax.random.normal(kx, (batch, num_fbanks, num_classes), jnp.float32)
    w1, w2, w3 = init_params(kp, num_fbanks, num_classes)

    def ref_fwd(xin):
        r = jnp.maximum(xin.reshape(xin.shape[0], -1) @ w1, 0.0)
        r = jnp.maximum(r @ w2, 0.0)
        return r @ w3

    # Tiny-batch path (single full-array block, no padding).
    out = classifier_forward(x, w1, w2, w3)
    jax.block_until_ready(out)
    assert out.shape == (batch, num_classes)
    ref = ref_fwd(x)
    # Kernel uses bf16 MXU inputs with f32 accumulation -> bf16-level tolerance.
    assert jnp.allclose(out, ref, atol=2e-2, rtol=2e-2), (
        f"max abs err {jnp.max(jnp.abs(out - ref))}")

    # Multi-tile path (grid > 1, batch padded) at a still-small shape.
    x_big = jax.random.normal(kx2, (100, num_fbanks, num_classes), jnp.float32)
    out_big = classifier_forward(x_big, w1, w2, w3, tm=32)
    jax.block_until_ready(out_big)
    assert out_big.shape == (100, num_classes)
    ref_big = ref_fwd(x_big)
    assert jnp.allclose(out_big, ref_big, atol=2e-2, rtol=2e-2), (
        f"max abs err {jnp.max(jnp.abs(out_big - ref_big))}")

    print("KERNEL_OK")
</pallas_src>

<mosaic_0001>
module attributes {stable_mosaic.version = 11 : i64} {
  func.func @classifier_kernel(%arg0: i32, %arg1: memref<2x128xf32, #tpu.memory_space<vmem>>, %arg2: memref<128x256xbf16, #tpu.memory_space<vmem>>, %arg3: memref<256x128xbf16, #tpu.memory_space<vmem>>, %arg4: memref<128x128xbf16, #tpu.memory_space<vmem>>, %arg5: memref<2x8xf32, #tpu.memory_space<vmem>>) attributes {dimension_semantics = [#tpu.dimension_semantics<parallel>], iteration_bounds = array<i64: 1>, scalar_prefetch = 0 : i64, scratch_operands = 0 : i64, tpu.core_type = #tpu.core_type<tc>, window_params = [{transform_indices = @transform_0, window_bounds = array<i64: 2, 128>}, {pipeline_mode = #tpu.pipeline_mode<synchronous>, transform_indices = @transform_1, window_bounds = array<i64: 128, 256>}, {pipeline_mode = #tpu.pipeline_mode<synchronous>, transform_indices = @transform_2, window_bounds = array<i64: 256, 128>}, {pipeline_mode = #tpu.pipeline_mode<synchronous>, transform_indices = @transform_3, window_bounds = array<i64: 128, 128>}, {transform_indices = @transform_4, window_bounds = array<i64: 2, 8>}]} {
    %c0 = arith.constant 0 : index
    %c0_0 = arith.constant 0 : index
    %0 = vector.load %arg1[%c0, %c0_0] : memref<2x128xf32, #tpu.memory_space<vmem>>, vector<2x128xf32>
    %1 = arith.truncf %0 : vector<2x128xf32> to vector<2x128xbf16>
    %c0_1 = arith.constant 0 : index
    %c0_2 = arith.constant 0 : index
    %2 = vector.load %arg2[%c0_1, %c0_2] : memref<128x256xbf16, #tpu.memory_space<vmem>>, vector<128x256xbf16>
    %cst = arith.constant dense<0.000000e+00> : vector<2x256xf32>
    %3 = tpu.matmul %1, %2, %cst {dimension_numbers = #tpu.dot_dimension_numbers<[1], [0], [0], [1], [0, 0, 1, 1], [], []>} : vector<2x128xbf16>, vector<128x256xbf16>, vector<2x256xf32> -> vector<2x256xf32>
    %cst_3 = arith.constant 0.000000e+00 : f32
    %4 = vector.broadcast %cst_3 : f32 to vector<2x256xf32>
    %5 = arith.maximumf %3, %4 : vector<2x256xf32>
    %6 = arith.truncf %5 : vector<2x256xf32> to vector<2x256xbf16>
    %c0_4 = arith.constant 0 : index
    %c0_5 = arith.constant 0 : index
    %7 = vector.load %arg3[%c0_4, %c0_5] : memref<256x128xbf16, #tpu.memory_space<vmem>>, vector<256x128xbf16>
    %cst_6 = arith.constant dense<0.000000e+00> : vector<2x128xf32>
    %8 = tpu.matmul %6, %7, %cst_6 {dimension_numbers = #tpu.dot_dimension_numbers<[1], [0], [0], [1], [0, 0, 1, 1], [], []>} : vector<2x256xbf16>, vector<256x128xbf16>, vector<2x128xf32> -> vector<2x128xf32>
    %cst_7 = arith.constant 0.000000e+00 : f32
    %9 = vector.broadcast %cst_7 : f32 to vector<2x128xf32>
    %10 = arith.maximumf %8, %9 : vector<2x128xf32>
    %11 = arith.truncf %10 : vector<2x128xf32> to vector<2x128xbf16>
    %c0_8 = arith.constant 0 : index
    %c0_9 = arith.constant 0 : index
    %12 = vector.load %arg4[%c0_8, %c0_9] : memref<128x128xbf16, #tpu.memory_space<vmem>>, vector<128x128xbf16>
    %cst_10 = arith.constant dense<0.000000e+00> : vector<2x128xf32>
    %13 = tpu.matmul %11, %12, %cst_10 {dimension_numbers = #tpu.dot_dimension_numbers<[1], [0], [0], [1], [0, 0, 1, 1], [], []>} : vector<2x128xbf16>, vector<128x128xbf16>, vector<2x128xf32> -> vector<2x128xf32>
    %14 = vector.extract_strided_slice %13 {offsets = [0, 0], sizes = [2, 8], strides = [1, 1]} : vector<2x128xf32> to vector<2x8xf32>
    %c0_11 = arith.constant 0 : index
    %c0_12 = arith.constant 0 : index
    %15 = vector.load %arg5[%c0_11, %c0_12] : memref<2x8xf32, #tpu.memory_space<vmem>>, vector<2x8xf32>
    tpu.vector_store %arg5[%c0_11, %c0_12], %14 {strides = array<i32>} : memref<2x8xf32, #tpu.memory_space<vmem>>, vector<2x8xf32>,
    return
  }
  func.func @transform_0(%arg0: i32) -> (i32, i32) {
    %c0_i32 = arith.constant 0 : i32
    %c0_i32_0 = arith.constant 0 : i32
    return %arg0, %c0_i32 : i32, i32
  }
  func.func @transform_1(%arg0: i32) -> (i32, i32) {
    %c0_i32 = arith.constant 0 : i32
    %c0_i32_0 = arith.constant 0 : i32
    %c0_i32_1 = arith.constant 0 : i32
    return %c0_i32, %c0_i32_0 : i32, i32
  }
  func.func @transform_2(%arg0: i32) -> (i32, i32) {
    %c0_i32 = arith.constant 0 : i32
    %c0_i32_0 = arith.constant 0 : i32
    %c0_i32_1 = arith.constant 0 : i32
    return %c0_i32, %c0_i32_0 : i32, i32
  }
  func.func @transform_3(%arg0: i32) -> (i32, i32) {
    %c0_i32 = arith.constant 0 : i32
    %c0_i32_0 = arith.constant 0 : i32
    %c0_i32_1 = arith.constant 0 : i32
    return %c0_i32, %c0_i32_0 : i32, i32
  }
  func.func @transform_4(%arg0: i32) -> (i32, i32) {
    %c0_i32 = arith.constant 0 : i32
    %c0_i32_0 = arith.constant 0 : i32
    return %arg0, %c0_i32 : i32, i32
  }
}

</mosaic_0001>

<bundles_post_ra>
// kernel: tpu_custom_call.1
= control target key start
LH: loop header
LB: loop body
LE: loop exit
PB: predicated region body
PF: predicated region fallthrough
CT: control target
= control target key end

     0   :  { %9 = vsyncpa [#allocation3], 0  ;;  %s874_s0 = inlined_call_operand.hbm [shape: f32[2,128], index: 0, kind: input, shape index: {}]   ;;  %s875_s1 = inlined_call_operand.hbm [shape: bf16[128,256], index: 1, kind: input, shape index: {}]   ;;  %s876_s2 = inlined_call_operand.hbm [shape: bf16[256,128], index: 2, kind: input, shape index: {}]   ;;  %s877_s3 = inlined_call_operand.hbm [shape: bf16[128,128], index: 3, kind: input, shape index: {}]   ;;  %s878_s4 = inlined_call_operand.hbm [shape: f32[2,8], index: 4, kind: output, shape index: {}]  }
   0x1   :  { %10 = vsyncpa [#allocation6], 0 }
   0x2   :  { %11 = vsyncpa [#allocation9], 0 }
   0x3   :  { %12 = vsyncpa [#allocation4], 0  ;;  %s777_s15 = smov [#allocation5]   ;;  %s659_s19 = scalar_lea.hbm %s875_s1, 2048 }
   0x4   :  { %s28_s16 = sshll.u32 %s777_s15, 4  ;;  %p660_p0 = scmp.ne.s32.totalorder %s875_s1, %s659_s19  ;;  %s29_s16 = int_to_ptr.vmem [resolvable:$true] %s28_s16 }
   0x5   :  { %p663_p1 = scmp.lt.u32.totalorder %s659_s19, %s875_s1 }
   0x7   :  { %p665_p2 = pnand %p663_p1, %p660_p0 }
   0x9   :  { %668 = shalt.err (!%p665_p2)
}
   0xa   :  { %s669_s24 = scalar_lea.vmem %s29_s16, 2048  ;;  %p674_p4 = scmp.lt.s32.totalorder %s29_s16, %s29_s16 }
   0xb   :  { %p670_p3 = scmp.ne.s32.totalorder %s29_s16, %s669_s24  ;;  %p675_p5 = scmp.lt.s32.totalorder %s669_s24, %s669_s24 }
   0xd   :  { %p676_p6 = por %p675_p5, %p674_p4 }
   0xf   :  { %p677_p7 = pnand %p676_p6, %p670_p3 }
  0x11   :  { %680 = shalt.err (!%p677_p7)
}
  0x12   :  { %s778_s25 = smov 128   ;;  %s779_s26 = smov 8  }
  0x13   :  { %34 = dma.hbm_to_vmem [thread:$0]  %s875_s1, 2048, %s29_s16, [#allocation6], %s778_s25, %s778_s25, %s779_s26  }
  0x14   :  { %s780_s29 = smov [#allocation2]   ;;  %s781_s5 = smov [#allocation7]  }
  0x15   :  { %s19_s30 = sshll.u32 %s780_s29, 4  ;;  %s40_s6 = sshll.u32 %s781_s5, 4  ;;  %s20_s30 = int_to_ptr.vmem [resolvable:$true] %s19_s30  ;;  %s41_s6 = int_to_ptr.vmem [resolvable:$true] %s40_s6 }
  0x16   :  { %s681_s9 = scalar_lea.hbm %s874_s0, 32 }
  0x17   :  { %p682_p8 = scmp.ne.s32.totalorder %s874_s0, %s681_s9  ;;  %p685_p9 = scmp.lt.u32.totalorder %s681_s9, %s874_s0 }
  0x19   :  { %p687_p10 = pnand %p685_p9, %p682_p8 }
  0x1b   :  { %690 = shalt.err (!%p687_p10)
}
  0x1c   :  { %s691_s1 = scalar_lea.vmem %s20_s30, 32  ;;  %p696_p12 = scmp.lt.s32.totalorder %s20_s30, %s20_s30 }
  0x1d   :  { %p692_p11 = scmp.ne.s32.totalorder %s20_s30, %s691_s1  ;;  %p697_p13 = scmp.lt.s32.totalorder %s691_s1, %s691_s1 }
  0x1f   :  { %p698_p0 = por %p697_p13, %p696_p12 }
  0x21   :  { %p699_p1 = pnand %p698_p0, %p692_p11 }
  0x23   :  { %702 = shalt.err (!%p699_p1)
}
  0x24   :  { %22 = dma.hbm_to_vmem [thread:$0]  %s874_s0, 32, %s20_s30, [#allocation3]  }
  0x25   :  { %s703_s18 = scalar_lea.hbm %s876_s2, 2048 }
  0x26   :  { %p704_p2 = scmp.ne.s32.totalorder %s876_s2, %s703_s18  ;;  %p707_p3 = scmp.lt.u32.totalorder %s703_s18, %s876_s2 }
  0x28   :  { %p709_p4 = pnand %p707_p3, %p704_p2 }
  0x2a   :  { %712 = shalt.err (!%p709_p4)
}
  0x2b   :  { %s713_s23 = scalar_lea.vmem %s41_s6, 2048  ;;  %p718_p6 = scmp.lt.s32.totalorder %s41_s6, %s41_s6 }
  0x2c   :  { %p714_p5 = scmp.ne.s32.totalorder %s41_s6, %s713_s23  ;;  %p719_p7 = scmp.lt.s32.totalorder %s713_s23, %s713_s23 }
  0x2e   :  { %p720_p8 = por %p719_p7, %p718_p6 }
  0x30   :  { %p721_p9 = pnand %p720_p8, %p714_p5 }
  0x32   :  { %724 = shalt.err (!%p721_p9)
}
  0x33   :  { %s782_s0 = smov 64   ;;  %s783_s24 = smov 4  }
  0x34   :  { %46 = dma.hbm_to_vmem [thread:$0]  %s876_s2, 2048, %s41_s6, [#allocation6], %s782_s0, %s782_s0, %s783_s24  }
  0x35   :  { %s784_s27 = smov [#allocation8]   ;;  %s725_s5 = scalar_lea.hbm %s877_s3, 1024 }
  0x36   :  { %s52_s28 = sshll.u32 %s784_s27, 4  ;;  %p726_p10 = scmp.ne.s32.totalorder %s877_s3, %s725_s5  ;;  %s53_s28 = int_to_ptr.vmem [resolvable:$true] %s52_s28 }
  0x37   :  { %p729_p11 = scmp.lt.u32.totalorder %s725_s5, %s877_s3 }
  0x39   :  { %p731_p12 = pnand %p729_p11, %p726_p10 }
  0x3b   :  { %734 = shalt.err (!%p731_p12)
}
  0x3c   :  { %s735_s11 = scalar_lea.vmem %s53_s28, 1024  ;;  %p740_p0 = scmp.lt.s32.totalorder %s53_s28, %s53_s28 }
  0x3d   :  { %p736_p13 = scmp.ne.s32.totalorder %s53_s28, %s735_s11  ;;  %p741_p1 = scmp.lt.s32.totalorder %s735_s11, %s735_s11 }
  0x3f   :  { %p742_p2 = por %p741_p1, %p740_p0 }
  0x41   :  { %p743_p3 = pnand %p742_p2, %p736_p13 }
  0x43   :  { %746 = shalt.err (!%p743_p3)
}
  0x44   :  { %58 = dma.hbm_to_vmem [thread:$0]  %s877_s3, 1024, %s53_s28, [#allocation9], %s782_s0, %s782_s0, %s783_s24  }
  0x45   :  { %769 = dma.done.wait [#allocation3], 32  }
  0x46   :  { %770 = vsyncadd [#allocation3], 4294967264 }
  0x47   :  { %771 = dma.done.wait [#allocation6], 4096  }
  0x48   :  { %772 = vsyncadd [#allocation6], 4294963200 }
  0x49   :  { %773 = dma.done.wait [#allocation9], 1024  }
  0x4a   :  { %774 = vsyncadd [#allocation9], 4294966272  ;;  %v785_v0 = vmov 0   ;;  %v611_v1 = vld [vmem:[#allocation5 + $0x4] ss:$8 sps:$4 sm:$0xff]   ;;  %v639_v15 = vld [vmem:[#allocation7 + $0x50] sm:$0xff]  }
  0x4b   :  { %202 = vmatprep.mubr.bf16.mxu0 %v785_v0  ;;  %v613_v2 = vld [vmem:[#allocation5] ss:$8 sps:$4 sm:$0xff]   ;;  %170 = vmatprep.subr.bf16.mxu0 %v611_v1  ;;  %v614_v3 = vld [vmem:[#allocation5 + $0x14] ss:$8 sps:$4 sm:$0xff]   ;;  %v616_v4 = vld [vmem:[#allocation5 + $0x10] ss:$8 sps:$4 sm:$0xff]  }
  0x4c   :  { %171 = vmatpush1.bf16.msra.mxu0 %v613_v2  ;;  %v617_v5 = vld [vmem:[#allocation5 + $0x24] ss:$8 sps:$4 sm:$0xff]   ;;  %v619_v6 = vld [vmem:[#allocation5 + $0x20] ss:$8 sps:$4 sm:$0xff]   ;;  %v620_v7 = vld [vmem:[#allocation5 + $0x34] ss:$8 sps:$4 sm:$0xff]  }
  0x4d   :  { %172 = vmatprep.subr.bf16.mxu0 %v614_v3  ;;  %v622_v8 = vld [vmem:[#allocation5 + $0x30] ss:$8 sps:$4 sm:$0xff]   ;;  %v623_v9 = vld [vmem:[#allocation5 + $0x44] ss:$8 sps:$4 sm:$0xff]   ;;  %v625_v12 = vld [vmem:[#allocation5 + $0x40] ss:$8 sps:$4 sm:$0xff]  }
  0x4e   :  { %v635_v10 = vld [vmem:[#allocation7 + $0x40] sm:$0xff]   ;;  %v637_v13 = vld [vmem:[#allocation7 + $0x48] sm:$0xff]   ;;  %v626_v16 = vld [vmem:[#allocation5 + $0x54] ss:$8 sps:$4 sm:$0xff]   ;;  %v786_v36 = vmov 0.0   ;;  %vm787_vm0 = vmmov 0  }
  0x4f   :  { %v636_v11 = vld [vmem:[#allocation7] sm:$0xff]   ;;  %548 = vmatprep.subr.bf16.mxu1 %v635_v10  ;;  %v638_v14 = vld [vmem:[#allocation7 + $0x8] sm:$0xff]   ;;  %v628_v17 = vld [vmem:[#allocation5 + $0x50] ss:$8 sps:$4 sm:$0xff]   ;;  %s788_s3 = smov [#allocation10]   ;;  %vm489_vm1 = vcmask 58368  }
  0x50   :  { %173 = vmatpush1.bf16.msra.mxu0 %v616_v4  ;;  %549 = vmatpush3.bf16.msra.mxu1 %v636_v11  ;;  %v640_v18 = vld [vmem:[#allocation7 + $0x10] sm:$0xff]   ;;  %v641_v19 = vld [vmem:[#allocation7 + $0x58] sm:$0xff]   ;;  %v629_v20 = vld [vmem:[#allocation5 + $0x64] ss:$8 sps:$4 sm:$0xff]   ;;  %s497_s12 = sshll.u32 %s788_s3, 4  ;;  %s498_s12 = int_to_ptr.vmem [resolvable:$true] %s497_s12 }
  0x51   :  { %174 = vmatprep.subr.bf16.mxu0 %v617_v5  ;;  %550 = vmatprep.subr.bf16.mxu1 %v637_v13  ;;  %v631_v21 = vld [vmem:[#allocation5 + $0x60] ss:$8 sps:$4 sm:$0xff]   ;;  %v632_v22 = vld [vmem:[#allocation5 + $0x74] ss:$8 sps:$4 sm:$0xff]   ;;  %v634_v26 = vld [vmem:[#allocation5 + $0x70] ss:$8 sps:$4 sm:$0xff]   ;;  %p752_p5 = scmp.lt.s32.totalorder %s498_s12, %s498_s12 }
  0x52   :  { %v642_v23 = vld [vmem:[#allocation7 + $0x18] sm:$0xff]   ;;  %v643_v24 = vld [vmem:[#allocation7 + $0x60] sm:$0xff]   ;;  %v645_v28 = vld [vmem:[#allocation7 + $0x68] sm:$0xff]   ;;  %s747_s13 = scalar_lea.vmem %s498_s12, 32 }
  0x53   :  { %v644_v25 = vld [vmem:[#allocation7 + $0x20] sm:$0xff]   ;;  %v72_v27 = vld [vmem:[#allocation2] sm:$0x3]  ;;  %v646_v29 = vld [vmem:[#allocation7 + $0x28] sm:$0xff]   ;;  %p748_p4 = scmp.ne.s32.totalorder %s498_s12, %s747_s13  ;;  %p753_p6 = scmp.lt.s32.totalorder %s747_s13, %s747_s13 }
  0x54   :  { %175 = vmatpush1.bf16.msra.mxu0 %v619_v6  ;;  %551 = vmatpush3.bf16.msra.mxu1 %v638_v14  ;;  %v73_v30 = vpack.c.bf16 %v72_v27, %v72_v27  ;;  %v647_v31 = vld [vmem:[#allocation7 + $0x70] sm:$0xff]   ;;  %v649_v33 = vld [vmem:[#allocation7 + $0x78] sm:$0xff]   ;;  %v651_v35 = vld [vmem:[#allocation8] sm:$0xff]  }
  0x55   :  { %176 = vmatprep.subr.bf16.mxu0 %v620_v7  ;;  %552 = vmatprep.subr.bf16.mxu1 %v639_v15  ;;  %v648_v32 = vld [vmem:[#allocation7 + $0x30] sm:$0xff]   ;;  %v650_v34 = vld [vmem:[#allocation7 + $0x38] sm:$0xff]   ;;  %v652_v37 = vld [vmem:[#allocation8 + $0x8] sm:$0xff]   ;;  %p754_p7 = por %p753_p6, %p752_p5 }
  0x56   :  { %v653_v38 = vld [vmem:[#allocation8 + $0x10] sm:$0xff]   ;;  %v654_v39 = vld [vmem:[#allocation8 + $0x18] sm:$0xff]   ;;  %v655_v40 = vld [vmem:[#allocation8 + $0x20] sm:$0xff]  }
  0x57   :  { %v656_v41 = vld [vmem:[#allocation8 + $0x28] sm:$0xff]   ;;  %v657_v50 = vld [vmem:[#allocation8 + $0x30] sm:$0xff]   ;;  %v658_v51 = vld [vmem:[#allocation8 + $0x38] sm:$0xff]   ;;  %p755_p8 = pnand %p754_p7, %p748_p4 }
  0x58   :  { %177 = vmatpush1.bf16.msra.mxu0 %v622_v8  ;;  %553 = vmatpush3.bf16.msra.mxu1 %v640_v18 }
  0x59   :  { %178 = vmatprep.subr.bf16.mxu0 %v623_v9  ;;  %554 = vmatprep.subr.bf16.mxu1 %v641_v19 }
  0x5c   :  { %179 = vmatpush1.bf16.msra.mxu0 %v625_v12  ;;  %555 = vmatpush3.bf16.msra.mxu1 %v642_v23 }
  0x5d   :  { %180 = vmatprep.subr.bf16.mxu0 %v626_v16  ;;  %556 = vmatprep.subr.bf16.mxu1 %v643_v24 }
  0x60   :  { %181 = vmatpush1.bf16.msra.mxu0 %v628_v17  ;;  %557 = vmatpush3.bf16.msra.mxu1 %v644_v25 }
  0x61   :  { %182 = vmatprep.subr.bf16.mxu0 %v629_v20  ;;  %558 = vmatprep.subr.bf16.mxu1 %v645_v28 }
  0x64   :  { %183 = vmatpush1.bf16.msra.mxu0 %v631_v21  ;;  %559 = vmatpush3.bf16.msra.mxu1 %v646_v29 }
  0x65   :  { %184 = vmatprep.subr.bf16.mxu0 %v632_v22  ;;  %560 = vmatprep.subr.bf16.mxu1 %v647_v31 }
  0x68   :  { %185 = vmatpush1.bf16.msra.mxu0 %v634_v26  ;;  %561 = vmatpush3.bf16.msra.mxu1 %v648_v32 }
  0x69   :  { %562 = vmatprep.subr.bf16.mxu1 %v649_v33  ;;  %579 = vmatprep.subr.bf16.mxu0 %v786_v36 }
  0x6b   :  { %203 = vmatmul.mubr.bf16.vlgmr.msra.gmra.mrb[0].mxu0 %v73_v30 }
  0x6c   :  { %563 = vmatpush3.bf16.msra.mxu1 %v650_v34  ;;  %580 = vmatpush3.bf16.msra.mxu0 %v651_v35 }
  0x6d   :  { %581 = vmatprep.subr.bf16.mxu0 %v786_v36  ;;  %595 = vmatprep.mubr.msk.bf16.mxu0 %vm787_vm0, %v786_v36 }
  0x70   :  { %582 = vmatpush3.bf16.msra.mxu0 %v652_v37 }
  0x71   :  { %583 = vmatprep.subr.bf16.mxu0 %v786_v36 }
  0x74   :  { %584 = vmatpush3.bf16.msra.mxu0 %v653_v38 }
  0x75   :  { %585 = vmatprep.subr.bf16.mxu0 %v786_v36 }
  0x78   :  { %586 = vmatpush3.bf16.msra.mxu0 %v654_v39 }
  0x79   :  { %587 = vmatprep.subr.bf16.mxu0 %v786_v36 }
  0x7c   :  { %588 = vmatpush3.bf16.msra.mxu0 %v655_v40 }
  0x7d   :  { %589 = vmatprep.subr.bf16.mxu0 %v786_v36 }
  0x80   :  { %590 = vmatpush3.bf16.msra.mxu0 %v656_v41 }
  0x81   :  { %591 = vmatprep.subr.bf16.mxu0 %v786_v36 }
  0x84   :  { %592 = vmatpush3.bf16.msra.mxu0 %v657_v50 }
  0x85   :  { %593 = vmatprep.subr.bf16.mxu0 %v786_v36 }
  0x88   :  { %594 = vmatpush3.bf16.msra.mxu0 %v658_v51 }
 0x13e   :  { %v204_v42 = vpop.f32.mrb[0].mxu0 }
 0x13f   :  { %v211_v43 = vmax.f32 %v204_v42, 0.0  ;;  %v206_v44 = vpop.f32.mrb[1].mxu0 }
 0x140   :  { %v208_v45 = vpop.f32.mrb[2].mxu0  ;;  %v212_v46 = vmax.f32 %v206_v44, 0.0 }
 0x141   :  { %v209_v47 = vpop.f32.mrb[3].mxu0  ;;  %v213_v49 = vpack.c.bf16 %v211_v43, %v211_v43 }
 0x142   :  { %v214_v48 = vpack.c.bf16 %v212_v46, %v212_v46 }
 0x144   :  { %375 = vmatprep.mubr.bf16.mxu1 %v214_v48 }
 0x145   :  { %376 = vmatmul.mubr.bf16.vlgmr.msra.gmra.mrb[0].mxu1 %v213_v49 }
 0x218   :  { %v564_v52 = vpop.f32.mrb[0].mxu1 }
 0x219   :  { %v565_v53 = vpop.f32.mrb[1].mxu1 }
 0x21a   :  { %v566_v54 = vadd.f32 %v565_v53, %v564_v52  ;;  %v567_v55 = vpop.f32.mrb[2].mxu1 }
 0x21b   :  { %v568_v56 = vpop.f32.mrb[3].mxu1 }
 0x21c   :  { %v383_v57 = vmax.f32 %v566_v54, 0.0 }
 0x21e   :  { %v384_v58 = vpack.c.bf16 %v383_v57, %v383_v57 }
 0x220   :  { %596 = vmatmul.mubr.bf16.vlgmr.msra.gmra.mrb[4].mxu0 %v384_v58 }
 0x2f3   :  { %v483_v59 = vpop.f32.mrb[4].mxu0 }
 0x2f4   :  { %v597_v60 = vpop.f32.mrb[5].mxu0  ;;  %490 = vst.msk [vmem:[#allocation10] sm:$0x3] %vm489_vm1, %v483_v59 }
 0x2f5   :  { %v486_v61 = vpop.f32.mrb[6].mxu0 }
 0x2f6   :  { %758 = shalt.err (!%p755_p8)
}
 0x2f7   :  { %s759_s15 = scalar_lea.hbm %s878_s4, 32 }
 0x2f8   :  { %p760_p9 = scmp.ne.s32.totalorder %s878_s4, %s759_s15  ;;  %p763_p10 = scmp.lt.u32.totalorder %s759_s15, %s878_s4 }
 0x2fa   :  { %p765_p11 = pnand %p763_p10, %p760_p9 }
 0x2fc   :  { %768 = shalt.err (!%p765_p11)
}
 0x2fd   :  { %500 = dma.vmem_to_hbm [thread:$0]  %s498_s12, 32, %s878_s4, [#allocation4]   ;;  %v598_v62 = vpop.f32.mrb[7].mxu0 }
 0x2fe   :  { %775 = dma.done.wait [#allocation4], 32  }
 0x2ff   :  { %776 = vsyncadd [#allocation4], 4294967264 }
 0x300   :  { %504 = vsyncpa [#allocation3], 1 }
 0x301   :  { %505 = vsyncpa [#allocation6], 1 }
 0x302   :  { %506 = vsyncpa [#allocation9], 1 }
 0x303   :  { %507 = vsyncpa [#allocation4], 1 }

</bundles_post_ra>
